<compile_context>
chip_gen: v7x
topology: tpu7x:2x2x1
jax: 0.10.0
libtpu: 0.0.40
codegen_flags: <defaults>
</compile_context>

<pallas_src>
import functools

import jax
import jax.numpy as jnp
from jax.experimental import pallas as pl
from jax.experimental.pallas import tpu as pltpu


LRELU_SLOPE = 0.25


# ---------------------------------------------------------------------------
# Fused GraphConvolution-layer kernel
# ---------------------------------------------------------------------------
def gcn_layer_kernel(adj_ref, x_ref, w_ref, b_ref, o_ref, acc_ref, *, slope):
    """One fused GCN layer tile.

    Per grid point (i, j, k):
        support_k = x[k_tile, :] @ W[:, j_tile]          (bf16 MXU, f32 result)
        acc      += adj[i_tile, k_tile] @ support_k      (bf16 MXU, f32 acc)
    Epilogue at the last k step: o = leaky_relu(acc + b, slope).
    The f32 scratch accumulator is kept (instead of accumulating into o_ref)
    because intermediate-layer outputs are emitted as bf16.
    """
    k = pl.program_id(2)

    @pl.when(k == 0)
    def _init():
        acc_ref[...] = jnp.zeros_like(acc_ref)

    support = jnp.dot(x_ref[...], w_ref[...],
                      preferred_element_type=jnp.float32)
    acc_ref[...] += jnp.dot(adj_ref[...], support.astype(adj_ref.dtype),
                            preferred_element_type=jnp.float32)

    @pl.when(k == pl.num_programs(2) - 1)
    def _epilogue():
        y = acc_ref[...] + b_ref[...]            # bias broadcast (1, tn) -> (tm, tn)
        o_ref[...] = jnp.where(y >= 0, y, slope * y).astype(o_ref.dtype)


# ---------------------------------------------------------------------------
# Wrappers
# ---------------------------------------------------------------------------
def _round_up(x, m):
    return ((x + m - 1) // m) * m


def _pad2d(a, rows, cols):
    pr, pc = rows - a.shape[0], cols - a.shape[1]
    if pr == 0 and pc == 0:
        return a
    return jnp.pad(a, ((0, pr), (0, pc)))


def _pick_tile(padded_dim, candidates=(512, 256, 128)):
    """Largest MXU-friendly tile that divides the (128-multiple) padded dim."""
    for t in candidates:
        if padded_dim % t == 0:
            return t
    return padded_dim


def gcn_layer_fused(adj_p, x_p, w_p, b_p, *, out_dtype, slope=LRELU_SLOPE):
    """leaky_relu(adj_p @ (x_p @ w_p) + b_p) on pre-padded operands."""
    Mp, Mp2 = adj_p.shape
    Mp3, Kp = x_p.shape
    Kp2, Np = w_p.shape
    assert Mp == Mp2 == Mp3 and Kp == Kp2, (adj_p.shape, x_p.shape, w_p.shape)

    t_node = _pick_tile(Mp)          # tiles the output rows and the k reduction
    tn = _pick_tile(Np)              # tiles the output features
    tm = tk = t_node

    grid = (Mp // tm, Np // tn, Mp // tk)

    in_itemsize = jnp.dtype(adj_p.dtype).itemsize
    out_itemsize = jnp.dtype(out_dtype).itemsize

    cost = pl.CostEstimate(
        flops=2 * Mp * Mp * Np + 2 * (Mp // tm) * Mp * Kp * Np,
        transcendentals=0,
        bytes_accessed=in_itemsize * (Mp * Mp + Mp * Kp + Kp * Np)
        + 4 * Np + out_itemsize * Mp * Np,
    )

    # Double-buffered inputs/output + f32 accumulator; only raise the scoped
    # VMEM limit when the working set actually needs it (v5e default = 16 MiB).
    vmem_bytes = (2 * in_itemsize * (tm * tk + tk * Kp + Kp * tn)
                  + 2 * 4 * tn + 2 * out_itemsize * tm * tn + 4 * tm * tn)
    vmem_limit = None
    if vmem_bytes > 12 * 1024 * 1024:
        vmem_limit = min(64 * 1024 * 1024, int(vmem_bytes * 1.5) + (4 << 20))

    kernel = functools.partial(gcn_layer_kernel, slope=slope)

    return pl.pallas_call(
        kernel,
        out_shape=jax.ShapeDtypeStruct((Mp, Np), out_dtype),
        grid_spec=pltpu.PrefetchScalarGridSpec(
            num_scalar_prefetch=0,
            grid=grid,
            in_specs=[
                pl.BlockSpec((tm, tk), lambda i, j, k: (i, k)),   # adj tile
                pl.BlockSpec((tk, Kp), lambda i, j, k: (k, 0)),   # x rows, full in-dim
                pl.BlockSpec((Kp, tn), lambda i, j, k: (0, j)),   # W (VMEM resident)
                pl.BlockSpec((1, tn), lambda i, j, k: (0, j)),    # bias
            ],
            out_specs=pl.BlockSpec((tm, tn), lambda i, j, k: (i, j)),
            scratch_shapes=[pltpu.VMEM((tm, tn), jnp.float32)],
        ),
        compiler_params=pltpu.CompilerParams(
            dimension_semantics=("parallel", "parallel", "arbitrary"),
            vmem_limit_bytes=vmem_limit,
        ),
        cost_estimate=cost,
    )(adj_p, x_p, w_p, b_p)


def gcn_e_forward(x, adj, params, slope=LRELU_SLOPE, use_bf16=True):
    """GCN_E forward (inference). params = [(W1,b1), (W2,b2), (W3,b3)].

    All node/feature dims are zero-padded to 128-multiples ONCE; the padded
    layout is carried across layers (zero-padded adj columns and zero-padded W
    rows make the padding numerically inert) and sliced only at the very end.
    """
    M, K0 = x.shape
    op_dtype = jnp.bfloat16 if use_bf16 else jnp.float32

    Mp = _round_up(M, 128)
    dims_p = [_round_up(K0, 128)] + [_round_up(w.shape[1], 128) for (w, _) in params]

    adj_p = _pad2d(adj.astype(op_dtype), Mp, Mp)            # padded + cast once
    h = _pad2d(x, Mp, dims_p[0]).astype(op_dtype)

    n_layers = len(params)
    for li, (w, b) in enumerate(params):
        w_p = _pad2d(w, dims_p[li], dims_p[li + 1]).astype(op_dtype)
        b_p = _pad2d(b.reshape(1, -1).astype(jnp.float32), 1, dims_p[li + 1])
        last = li == n_layers - 1
        out_dtype = jnp.float32 if last else op_dtype        # bf16 intermediates
        h = gcn_layer_fused(adj_p, h, w_p, b_p, out_dtype=out_dtype, slope=slope)
        # TODO(synk): F.dropout(training=True) path not implemented; identity at inference.

    out_features = params[-1][0].shape[1]
    return h[:M, :out_features]


# ---------------------------------------------------------------------------
# Init helpers (match nn.init.xavier_normal_ / bias.fill_(0.0))
# ---------------------------------------------------------------------------
def xavier_normal(key, in_features, out_features, dtype=jnp.float32):
    std = (2.0 / (in_features + out_features)) ** 0.5
    return std * jax.random.normal(key, (in_features, out_features), dtype=dtype)


# ---------------------------------------------------------------------------
# Demo / correctness check
# ---------------------------------------------------------------------------
if __name__ == "__main__":
    key = jax.random.PRNGKey(0)
    keys = jax.random.split(key, 6)

    num_nodes = 16
    in_dim = 32
    hgcn_dim = (64, 64, 32)

    # node features
    x = jax.random.normal(keys[0], (num_nodes, in_dim), dtype=jnp.float32)

    # dense, row-normalized adjacency (stand-in for the torch sparse adj)
    adj = (jax.random.uniform(keys[1], (num_nodes, num_nodes)) > 0.7).astype(jnp.float32)
    adj = adj + jnp.eye(num_nodes, dtype=jnp.float32)
    adj = adj / jnp.sum(adj, axis=1, keepdims=True)

    dims = (in_dim,) + hgcn_dim
    params = []
    for li in range(3):
        w = xavier_normal(keys[2 + li], dims[li], dims[li + 1])
        b = jnp.zeros((dims[li + 1],), dtype=jnp.float32)   # bias.data.fill_(0.0)
        params.append((w, b))

    fwd = jax.jit(functools.partial(gcn_e_forward, use_bf16=True))
    y = fwd(x, adj, params)
    jax.block_until_ready(y)

    # pure-JAX f32 reference
    def ref_forward(x, adj, params, slope=LRELU_SLOPE):
        h = x
        for (w, b) in params:
            h = adj @ (h @ w) + b
            h = jnp.where(h >= 0, h, slope * h)
        return h

    y_ref = ref_forward(x, adj, params)

    assert y.shape == (num_nodes, hgcn_dim[2]), y.shape
    max_err = float(jnp.max(jnp.abs(y - y_ref)))
    # bf16 MXU operands with f32 accumulation -> ~1e-2 level tolerance.
    assert jnp.allclose(y, y_ref, atol=5e-2, rtol=5e-2), max_err

    print("KERNEL_OK")
</pallas_src>

<mosaic_0001>
module attributes {stable_mosaic.version = 11 : i64} {
  func.func @gcn_layer_kernel(%arg0: i32, %arg1: i32, %arg2: i32, %arg3: memref<128x128xbf16, #tpu.memory_space<vmem>>, %arg4: memref<128x128xbf16, #tpu.memory_space<vmem>>, %arg5: memref<128x128xbf16, #tpu.memory_space<vmem>>, %arg6: memref<1x128xf32, #tpu.memory_space<vmem>>, %arg7: memref<128x128xbf16, #tpu.memory_space<vmem>>, %arg8: memref<128x128xf32, #tpu.memory_space<vmem>>) attributes {dimension_semantics = [#tpu.dimension_semantics<parallel>, #tpu.dimension_semantics<parallel>, #tpu.dimension_semantics<arbitrary>], iteration_bounds = array<i64: 1, 1, 1>, scalar_prefetch = 0 : i64, scratch_operands = 1 : i64, tpu.core_type = #tpu.core_type<tc>, window_params = [{transform_indices = @transform_0, window_bounds = array<i64: 128, 128>}, {transform_indices = @transform_1, window_bounds = array<i64: 128, 128>}, {transform_indices = @transform_2, window_bounds = array<i64: 128, 128>}, {transform_indices = @transform_3, window_bounds = array<i64: 1, 128>}, {transform_indices = @transform_4, window_bounds = array<i64: 128, 128>}]} {
    %c0_i32 = arith.constant 0 : i32
    %0 = arith.cmpi eq, %arg2, %c0_i32 : i32
    %1 = arith.extui %0 : i1 to i32
    %c0_i32_0 = arith.constant 0 : i32
    %2 = arith.cmpi ne, %1, %c0_i32_0 : i32
    scf.if %2 {
      %cst_13 = arith.constant 0.000000e+00 : f32
      %15 = vector.broadcast %cst_13 : f32 to vector<128x128xf32>
      %c0_14 = arith.constant 0 : index
      %c0_15 = arith.constant 0 : index
      %16 = vector.load %arg8[%c0_14, %c0_15] : memref<128x128xf32, #tpu.memory_space<vmem>>, vector<128x128xf32>
      tpu.vector_store %arg8[%c0_14, %c0_15], %15 {strides = array<i32>} : memref<128x128xf32, #tpu.memory_space<vmem>>, vector<128x128xf32>,
    } else {
    }
    %c0 = arith.constant 0 : index
    %c0_1 = arith.constant 0 : index
    %3 = vector.load %arg4[%c0, %c0_1] : memref<128x128xbf16, #tpu.memory_space<vmem>>, vector<128x128xbf16>
    %c0_2 = arith.constant 0 : index
    %c0_3 = arith.constant 0 : index
    %4 = vector.load %arg5[%c0_2, %c0_3] : memref<128x128xbf16, #tpu.memory_space<vmem>>, vector<128x128xbf16>
    %cst = arith.constant dense<0.000000e+00> : vector<128x128xf32>
    %5 = tpu.matmul %3, %4, %cst {dimension_numbers = #tpu.dot_dimension_numbers<[1], [0], [0], [1], [0, 0, 1, 1], [], []>} : vector<128x128xbf16>, vector<128x128xbf16>, vector<128x128xf32> -> vector<128x128xf32>
    %c0_4 = arith.constant 0 : index
    %c0_5 = arith.constant 0 : index
    %6 = vector.load %arg8[%c0_4, %c0_5] : memref<128x128xf32, #tpu.memory_space<vmem>>, vector<128x128xf32>
    %c0_6 = arith.constant 0 : index
    %c0_7 = arith.constant 0 : index
    %7 = vector.load %arg3[%c0_6, %c0_7] : memref<128x128xbf16, #tpu.memory_space<vmem>>, vector<128x128xbf16>
    %8 = arith.truncf %5 : vector<128x128xf32> to vector<128x128xbf16>
    %cst_8 = arith.constant dense<0.000000e+00> : vector<128x128xf32>
    %9 = tpu.matmul %7, %8, %cst_8 {dimension_numbers = #tpu.dot_dimension_numbers<[1], [0], [0], [1], [0, 0, 1, 1], [], []>} : vector<128x128xbf16>, vector<128x128xbf16>, vector<128x128xf32> -> vector<128x128xf32>
    %10 = arith.addf %6, %9 : vector<128x128xf32>
    %c0_9 = arith.constant 0 : index
    %c0_10 = arith.constant 0 : index
    %11 = vector.load %arg8[%c0_9, %c0_10] : memref<128x128xf32, #tpu.memory_space<vmem>>, vector<128x128xf32>
    tpu.vector_store %arg8[%c0_9, %c0_10], %10 {strides = array<i32>} : memref<128x128xf32, #tpu.memory_space<vmem>>, vector<128x128xf32>,
    %c0_i32_11 = arith.constant 0 : i32
    %12 = arith.cmpi eq, %arg2, %c0_i32_11 : i32
    %13 = arith.extui %12 : i1 to i32
    %c0_i32_12 = arith.constant 0 : i32
    %14 = arith.cmpi ne, %13, %c0_i32_12 : i32
    scf.if %14 {
      %c0_13 = arith.constant 0 : index
      %c0_14 = arith.constant 0 : index
      %15 = vector.load %arg8[%c0_13, %c0_14] : memref<128x128xf32, #tpu.memory_space<vmem>>, vector<128x128xf32>
      %c0_15 = arith.constant 0 : index
      %c0_16 = arith.constant 0 : index
      %16 = vector.load %arg6[%c0_15, %c0_16] : memref<1x128xf32, #tpu.memory_space<vmem>>, vector<1x128xf32>
      %17 = vector.broadcast %16 : vector<1x128xf32> to vector<128x128xf32>
      %18 = arith.addf %15, %17 : vector<128x128xf32>
      %cst_17 = arith.constant 0.000000e+00 : f32
      %19 = vector.broadcast %cst_17 : f32 to vector<128x128xf32>
      %20 = arith.cmpf oge, %18, %19 : vector<128x128xf32>
      %cst_18 = arith.constant 2.500000e-01 : f32
      %21 = vector.broadcast %cst_18 : f32 to vector<128x128xf32>
      %22 = arith.mulf %21, %18 : vector<128x128xf32>
      %23 = arith.select %20, %18, %22 : vector<128x128xi1>, vector<128x128xf32>
      %24 = arith.truncf %23 : vector<128x128xf32> to vector<128x128xbf16>
      %c0_19 = arith.constant 0 : index
      %c0_20 = arith.constant 0 : index
      %25 = vector.load %arg7[%c0_19, %c0_20] : memref<128x128xbf16, #tpu.memory_space<vmem>>, vector<128x128xbf16>
      tpu.vector_store %arg7[%c0_19, %c0_20], %24 {strides = array<i32>} : memref<128x128xbf16, #tpu.memory_space<vmem>>, vector<128x128xbf16>,
    } else {
    }
    return
  }
  func.func @transform_0(%arg0: i32, %arg1: i32, %arg2: i32) -> (i32, i32) {
    %c0_i32 = arith.constant 0 : i32
    return %arg0, %arg2 : i32, i32
  }
  func.func @transform_1(%arg0: i32, %arg1: i32, %arg2: i32) -> (i32, i32) {
    %c0_i32 = arith.constant 0 : i32
    %c0_i32_0 = arith.constant 0 : i32
    return %arg2, %c0_i32 : i32, i32
  }
  func.func @transform_2(%arg0: i32, %arg1: i32, %arg2: i32) -> (i32, i32) {
    %c0_i32 = arith.constant 0 : i32
    %c0_i32_0 = arith.constant 0 : i32
    return %c0_i32, %arg1 : i32, i32
  }
  func.func @transform_3(%arg0: i32, %arg1: i32, %arg2: i32) -> (i32, i32) {
    %c0_i32 = arith.constant 0 : i32
    %c0_i32_0 = arith.constant 0 : i32
    return %c0_i32, %arg1 : i32, i32
  }
  func.func @transform_4(%arg0: i32, %arg1: i32, %arg2: i32) -> (i32, i32) {
    %c0_i32 = arith.constant 0 : i32
    return %arg0, %arg1 : i32, i32
  }
}

module attributes {stable_mosaic.version = 11 : i64} {
  func.func @gcn_layer_kernel(%arg0: i32, %arg1: i32, %arg2: i32, %arg3: memref<128x128xbf16, #tpu.memory_space<vmem>>, %arg4: memref<128x128xbf16, #tpu.memory_space<vmem>>, %arg5: memref<128x128xbf16, #tpu.memory_space<vmem>>, %arg6: memref<1x128xf32, #tpu.memory_space<vmem>>, %arg7: memref<128x128xf32, #tpu.memory_space<vmem>>, %arg8: memref<128x128xf32, #tpu.memory_space<vmem>>) attributes {dimension_semantics = [#tpu.dimension_semantics<parallel>, #tpu.dimension_semantics<parallel>, #tpu.dimension_semantics<arbitrary>], iteration_bounds = array<i64: 1, 1, 1>, scalar_prefetch = 0 : i64, scratch_operands = 1 : i64, tpu.core_type = #tpu.core_type<tc>, window_params = [{transform_indices = @transform_0, window_bounds = array<i64: 128, 128>}, {transform_indices = @transform_1, window_bounds = array<i64: 128, 128>}, {transform_indices = @transform_2, window_bounds = array<i64: 128, 128>}, {transform_indices = @transform_3, window_bounds = array<i64: 1, 128>}, {transform_indices = @transform_4, window_bounds = array<i64: 128, 128>}]} {
    %c0_i32 = arith.constant 0 : i32
    %0 = arith.cmpi eq, %arg2, %c0_i32 : i32
    %1 = arith.extui %0 : i1 to i32
    %c0_i32_0 = arith.constant 0 : i32
    %2 = arith.cmpi ne, %1, %c0_i32_0 : i32
    scf.if %2 {
      %cst_13 = arith.constant 0.000000e+00 : f32
      %15 = vector.broadcast %cst_13 : f32 to vector<128x128xf32>
      %c0_14 = arith.constant 0 : index
      %c0_15 = arith.constant 0 : index
      %16 = vector.load %arg8[%c0_14, %c0_15] : memref<128x128xf32, #tpu.memory_space<vmem>>, vector<128x128xf32>
      tpu.vector_store %arg8[%c0_14, %c0_15], %15 {strides = array<i32>} : memref<128x128xf32, #tpu.memory_space<vmem>>, vector<128x128xf32>,
    } else {
    }
    %c0 = arith.constant 0 : index
    %c0_1 = arith.constant 0 : index
    %3 = vector.load %arg4[%c0, %c0_1] : memref<128x128xbf16, #tpu.memory_space<vmem>>, vector<128x128xbf16>
    %c0_2 = arith.constant 0 : index
    %c0_3 = arith.constant 0 : index
    %4 = vector.load %arg5[%c0_2, %c0_3] : memref<128x128xbf16, #tpu.memory_space<vmem>>, vector<128x128xbf16>
    %cst = arith.constant dense<0.000000e+00> : vector<128x128xf32>
    %5 = tpu.matmul %3, %4, %cst {dimension_numbers = #tpu.dot_dimension_numbers<[1], [0], [0], [1], [0, 0, 1, 1], [], []>} : vector<128x128xbf16>, vector<128x128xbf16>, vector<128x128xf32> -> vector<128x128xf32>
    %c0_4 = arith.constant 0 : index
    %c0_5 = arith.constant 0 : index
    %6 = vector.load %arg8[%c0_4, %c0_5] : memref<128x128xf32, #tpu.memory_space<vmem>>, vector<128x128xf32>
    %c0_6 = arith.constant 0 : index
    %c0_7 = arith.constant 0 : index
    %7 = vector.load %arg3[%c0_6, %c0_7] : memref<128x128xbf16, #tpu.memory_space<vmem>>, vector<128x128xbf16>
    %8 = arith.truncf %5 : vector<128x128xf32> to vector<128x128xbf16>
    %cst_8 = arith.constant dense<0.000000e+00> : vector<128x128xf32>
    %9 = tpu.matmul %7, %8, %cst_8 {dimension_numbers = #tpu.dot_dimension_numbers<[1], [0], [0], [1], [0, 0, 1, 1], [], []>} : vector<128x128xbf16>, vector<128x128xbf16>, vector<128x128xf32> -> vector<128x128xf32>
    %10 = arith.addf %6, %9 : vector<128x128xf32>
    %c0_9 = arith.constant 0 : index
    %c0_10 = arith.constant 0 : index
    %11 = vector.load %arg8[%c0_9, %c0_10] : memref<128x128xf32, #tpu.memory_space<vmem>>, vector<128x128xf32>
    tpu.vector_store %arg8[%c0_9, %c0_10], %10 {strides = array<i32>} : memref<128x128xf32, #tpu.memory_space<vmem>>, vector<128x128xf32>,
    %c0_i32_11 = arith.constant 0 : i32
    %12 = arith.cmpi eq, %arg2, %c0_i32_11 : i32
    %13 = arith.extui %12 : i1 to i32
    %c0_i32_12 = arith.constant 0 : i32
    %14 = arith.cmpi ne, %13, %c0_i32_12 : i32
    scf.if %14 {
      %c0_13 = arith.constant 0 : index
      %c0_14 = arith.constant 0 : index
      %15 = vector.load %arg8[%c0_13, %c0_14] : memref<128x128xf32, #tpu.memory_space<vmem>>, vector<128x128xf32>
      %c0_15 = arith.constant 0 : index
      %c0_16 = arith.constant 0 : index
      %16 = vector.load %arg6[%c0_15, %c0_16] : memref<1x128xf32, #tpu.memory_space<vmem>>, vector<1x128xf32>
      %17 = vector.broadcast %16 : vector<1x128xf32> to vector<128x128xf32>
      %18 = arith.addf %15, %17 : vector<128x128xf32>
      %cst_17 = arith.constant 0.000000e+00 : f32
      %19 = vector.broadcast %cst_17 : f32 to vector<128x128xf32>
      %20 = arith.cmpf oge, %18, %19 : vector<128x128xf32>
      %cst_18 = arith.constant 2.500000e-01 : f32
      %21 = vector.broadcast %cst_18 : f32 to vector<128x128xf32>
      %22 = arith.mulf %21, %18 : vector<128x128xf32>
      %23 = arith.select %20, %18, %22 : vector<128x128xi1>, vector<128x128xf32>
      %c0_19 = arith.constant 0 : index
      %c0_20 = arith.constant 0 : index
      %24 = vector.load %arg7[%c0_19, %c0_20] : memref<128x128xf32, #tpu.memory_space<vmem>>, vector<128x128xf32>
      tpu.vector_store %arg7[%c0_19, %c0_20], %23 {strides = array<i32>} : memref<128x128xf32, #tpu.memory_space<vmem>>, vector<128x128xf32>,
    } else {
    }
    return
  }
  func.func @transform_0(%arg0: i32, %arg1: i32, %arg2: i32) -> (i32, i32) {
    %c0_i32 = arith.constant 0 : i32
    return %arg0, %arg2 : i32, i32
  }
  func.func @transform_1(%arg0: i32, %arg1: i32, %arg2: i32) -> (i32, i32) {
    %c0_i32 = arith.constant 0 : i32
    %c0_i32_0 = arith.constant 0 : i32
    return %arg2, %c0_i32 : i32, i32
  }
  func.func @transform_2(%arg0: i32, %arg1: i32, %arg2: i32) -> (i32, i32) {
    %c0_i32 = arith.constant 0 : i32
    %c0_i32_0 = arith.constant 0 : i32
    return %c0_i32, %arg1 : i32, i32
  }
  func.func @transform_3(%arg0: i32, %arg1: i32, %arg2: i32) -> (i32, i32) {
    %c0_i32 = arith.constant 0 : i32
    %c0_i32_0 = arith.constant 0 : i32
    return %c0_i32, %arg1 : i32, i32
  }
  func.func @transform_4(%arg0: i32, %arg1: i32, %arg2: i32) -> (i32, i32) {
    %c0_i32 = arith.constant 0 : i32
    return %arg0, %arg1 : i32, i32
  }
}

</mosaic_0001>

<bundles_post_ra>
// kernel: gcn_e_forward.5
= control target key start
LH: loop header
LB: loop body
LE: loop exit
PB: predicated region body
PF: predicated region fallthrough
CT: control target
= control target key end

     0   :  { %s901_s2 = inlined_call_operand.vmem [shape: bf16[128,128], index: 2, kind: input, shape index: {}]   ;;  %s902_s1 = inlined_call_operand.vmem [shape: bf16[128,128], index: 1, kind: input, shape index: {}]   ;;  %s903_s0 = inlined_call_operand.vmem [shape: bf16[128,128], index: 0, kind: input, shape index: {}]   ;;  %s904_s3 = inlined_call_operand.vmem [shape: f32[1,128], index: 3, kind: input, shape index: {}]   ;;  %s905_s4 = inlined_call_operand.vmem [shape: f32[128,128], index: 4, kind: output, shape index: {}]  }
   0x1   :  { %v711_v0 = vld [vmem:[%s901_s2] sm:$0xff]   ;;  %v712_v1 = vld [vmem:[%s901_s2 + $0x8] sm:$0xff]   ;;  %v713_v2 = vld [vmem:[%s901_s2 + $0x10] sm:$0xff]  }
   0x2   :  { %647 = vmatprep.subr.bf16.mxu0 %v711_v0  ;;  %v714_v3 = vld [vmem:[%s901_s2 + $0x18] sm:$0xff]   ;;  %v719_v4 = vld [vmem:[%s902_s1] sm:$0xff]   ;;  %v716_v6 = vld [vmem:[%s901_s2 + $0x28] sm:$0xff]  }
   0x3   :  { %648 = vmatpush3.bf16.msra.mxu0 %v711_v0  ;;  %663 = vmatprep.mubr.bf16.mxu0 %v719_v4  ;;  %v715_v5 = vld [vmem:[%s901_s2 + $0x20] sm:$0xff]   ;;  %v717_v7 = vld [vmem:[%s901_s2 + $0x30] sm:$0xff]   ;;  %v718_v8 = vld [vmem:[%s901_s2 + $0x38] sm:$0xff]  }
   0x4   :  { %649 = vmatprep.subr.bf16.mxu0 %v712_v1  ;;  %v720_v9 = vld [vmem:[%s902_s1 + $0x8] sm:$0xff]   ;;  %v721_v10 = vld [vmem:[%s902_s1 + $0x10] sm:$0xff]   ;;  %v722_v11 = vld [vmem:[%s902_s1 + $0x18] sm:$0xff]  }
   0x5   :  { %v723_v12 = vld [vmem:[%s902_s1 + $0x20] sm:$0xff]   ;;  %v724_v13 = vld [vmem:[%s902_s1 + $0x28] sm:$0xff]   ;;  %v725_v14 = vld [vmem:[%s902_s1 + $0x30] sm:$0xff]  }
   0x6   :  { %v726_v15 = vld [vmem:[%s902_s1 + $0x38] sm:$0xff]   ;;  %v727_v16 = vld [vmem:[%s903_s0] sm:$0xff]   ;;  %v728_v41 = vld [vmem:[%s903_s0 + $0x8] sm:$0xff]  }
   0x7   :  { %650 = vmatpush3.bf16.msra.mxu0 %v712_v1  ;;  %695 = vmatprep.mubr.bf16.mxu1 %v727_v16  ;;  %v729_v42 = vld [vmem:[%s903_s0 + $0x10] sm:$0xff]   ;;  %v730_v43 = vld [vmem:[%s903_s0 + $0x18] sm:$0xff]   ;;  %v731_v44 = vld [vmem:[%s903_s0 + $0x20] sm:$0xff]  }
   0x8   :  { %651 = vmatprep.subr.bf16.mxu0 %v713_v2  ;;  %v732_v45 = vld [vmem:[%s903_s0 + $0x28] sm:$0xff]   ;;  %v733_v46 = vld [vmem:[%s903_s0 + $0x30] sm:$0xff]   ;;  %v734_v47 = vld [vmem:[%s903_s0 + $0x38] sm:$0xff]  }
   0x9   :  { %v835_v48 = vld [vmem:[%s904_s3] ss:$0 sm:$0xff] }
   0xb   :  { %652 = vmatpush3.bf16.msra.mxu0 %v713_v2 }
   0xc   :  { %653 = vmatprep.subr.bf16.mxu0 %v714_v3 }
   0xf   :  { %654 = vmatpush3.bf16.msra.mxu0 %v714_v3 }
  0x10   :  { %655 = vmatprep.subr.bf16.mxu0 %v715_v5 }
  0x13   :  { %656 = vmatpush3.bf16.msra.mxu0 %v715_v5 }
  0x14   :  { %657 = vmatprep.subr.bf16.mxu0 %v716_v6 }
  0x17   :  { %658 = vmatpush3.bf16.msra.mxu0 %v716_v6 }
  0x18   :  { %659 = vmatprep.subr.bf16.mxu0 %v717_v7 }
  0x1b   :  { %660 = vmatpush3.bf16.msra.mxu0 %v717_v7 }
  0x1c   :  { %661 = vmatprep.subr.bf16.mxu0 %v718_v8 }
  0x1f   :  { %662 = vmatpush3.bf16.msra.mxu0 %v718_v8 }
  0x22   :  { %664 = vmatmul.mubr.bf16.vlgmr.msra.gmra.mrb[0].mxu0 %v720_v9 }
  0x23   :  { %667 = vmatprep.mubr.bf16.mxu0 %v721_v10 }
  0x2a   :  { %668 = vmatmul.mubr.bf16.gmra.mrb[4].mxu0 %v722_v11 }
  0x2b   :  { %671 = vmatprep.mubr.bf16.mxu0 %v723_v12 }
  0x32   :  { %672 = vmatmul.mubr.bf16.gmra.mrb[8].mxu0 %v724_v13 }
  0x33   :  { %675 = vmatprep.mubr.bf16.mxu0 %v725_v14 }
  0x3a   :  { %676 = vmatmul.mubr.bf16.gmra.mrb[12].mxu0 %v726_v15 }
  0xf5   :  { %v665_v17 = vpop.f32.mrb[0].mxu0 }
  0xf6   :  { %v200_v18 = vpop.f32.mrb[1].mxu0 }
  0xf7   :  { %v666_v19 = vpop.f32.mrb[2].mxu0 }
  0xf8   :  { %v296_v20 = vpack.c.bf16 %v666_v19, %v665_v17  ;;  %v203_v21 = vpop.f32.mrb[3].mxu0 }
  0xf9   :  { %v295_v22 = vpack.c.bf16 %v203_v21, %v200_v18 }
  0xfb   :  { %679 = vmatprep.subr.bf16.mxu1 %v295_v22 }
  0xfc   :  { %680 = vmatpush3.bf16.msra.mxu1 %v295_v22 }
  0xfd   :  { %v669_v23 = vpop.f32.mrb[4].mxu0  ;;  %681 = vmatprep.subr.bf16.mxu1 %v296_v20 }
  0xfe   :  { %v216_v24 = vpop.f32.mrb[5].mxu0 }
  0xff   :  { %v670_v25 = vpop.f32.mrb[6].mxu0 }
 0x100   :  { %v298_v26 = vpack.c.bf16 %v670_v25, %v669_v23  ;;  %v219_v27 = vpop.f32.mrb[7].mxu0  ;;  %682 = vmatpush3.bf16.msra.mxu1 %v296_v20 }
 0x101   :  { %v297_v28 = vpack.c.bf16 %v219_v27, %v216_v24 }
 0x103   :  { %683 = vmatprep.subr.bf16.mxu1 %v297_v28 }
 0x104   :  { %684 = vmatpush3.bf16.msra.mxu1 %v297_v28 }
 0x105   :  { %v673_v29 = vpop.f32.mrb[8].mxu0  ;;  %685 = vmatprep.subr.bf16.mxu1 %v298_v26 }
 0x106   :  { %v232_v30 = vpop.f32.mrb[9].mxu0 }
 0x107   :  { %v674_v31 = vpop.f32.mrb[10].mxu0 }
 0x108   :  { %v300_v32 = vpack.c.bf16 %v674_v31, %v673_v29  ;;  %v235_v33 = vpop.f32.mrb[11].mxu0  ;;  %686 = vmatpush3.bf16.msra.mxu1 %v298_v26 }
 0x109   :  { %v299_v34 = vpack.c.bf16 %v235_v33, %v232_v30 }
 0x10b   :  { %687 = vmatprep.subr.bf16.mxu1 %v299_v34 }
 0x10c   :  { %688 = vmatpush3.bf16.msra.mxu1 %v299_v34 }
 0x10d   :  { %v677_v35 = vpop.f32.mrb[12].mxu0  ;;  %689 = vmatprep.subr.bf16.mxu1 %v300_v32 }
 0x10e   :  { %v248_v36 = vpop.f32.mrb[13].mxu0 }
 0x10f   :  { %v678_v37 = vpop.f32.mrb[14].mxu0 }
 0x110   :  { %v302_v38 = vpack.c.bf16 %v678_v37, %v677_v35  ;;  %v251_v39 = vpop.f32.mrb[15].mxu0  ;;  %690 = vmatpush3.bf16.msra.mxu1 %v300_v32 }
 0x111   :  { %v301_v40 = vpack.c.bf16 %v251_v39, %v248_v36 }
 0x113   :  { %691 = vmatprep.subr.bf16.mxu1 %v301_v40 }
 0x114   :  { %692 = vmatpush3.bf16.msra.mxu1 %v301_v40 }
 0x115   :  { %693 = vmatprep.subr.bf16.mxu1 %v302_v38 }
 0x118   :  { %694 = vmatpush3.bf16.msra.mxu1 %v302_v38 }
 0x11b   :  { %696 = vmatmul.mubr.bf16.vlgmr.msra.gmra.mrb[0].mxu1 %v728_v41 }
 0x11c   :  { %699 = vmatprep.mubr.bf16.mxu1 %v729_v42 }
 0x123   :  { %700 = vmatmul.mubr.bf16.gmra.mrb[4].mxu1 %v730_v43 }
 0x124   :  { %703 = vmatprep.mubr.bf16.mxu1 %v731_v44 }
 0x12b   :  { %704 = vmatmul.mubr.bf16.gmra.mrb[8].mxu1 %v732_v45 }
 0x12c   :  { %707 = vmatprep.mubr.bf16.mxu1 %v733_v46 }
 0x133   :  { %708 = vmatmul.mubr.bf16.gmra.mrb[12].mxu1 %v734_v47 }
 0x1ee   :  { %v697_v49 = vpop.f32.mrb[0].mxu1 }
 0x1ef   :  { %v508_v50 = vadd.f32 %v697_v49, %v835_v48  ;;  %v385_v51 = vpop.f32.mrb[1].mxu1 }
 0x1f0   :  { %v506_v52 = vadd.f32 %v835_v48, %v385_v51  ;;  %v698_v53 = vpop.f32.mrb[2].mxu1 }
 0x1f1   :  { %vm524_vm0 = vcmp.ge.f32.partialorder %v508_v50, 0.0  ;;  %v540_v54 = vmul.f32 0.25, %v508_v50  ;;  %v509_v55 = vadd.f32 %v698_v53, %v835_v48  ;;  %v388_v56 = vpop.f32.mrb[3].mxu1 }
 0x1f2   :  { %vm522_vm1 = vcmp.ge.f32.partialorder %v506_v52, 0.0  ;;  %v538_v57 = vmul.f32 0.25, %v506_v52  ;;  %v507_v58 = vadd.f32 %v835_v48, %v388_v56 }
 0x1f3   :  { %v556_v59 = vsel %vm524_vm0, %v508_v50, %v540_v54  ;;  %vm525_vm2 = vcmp.ge.f32.partialorder %v509_v55, 0.0  ;;  %v541_v60 = vmul.f32 0.25, %v509_v55 }
 0x1f4   :  { %572 = vst [vmem:[%s905_s4 + $0x10] sm:$0xff] %v556_v59  ;;  %v554_v61 = vsel %vm522_vm1, %v506_v52, %v538_v57  ;;  %vm523_vm3 = vcmp.ge.f32.partialorder %v507_v58, 0.0  ;;  %v539_v62 = vmul.f32 0.25, %v507_v58 }
 0x1f5   :  { %570 = vst [vmem:[%s905_s4] sm:$0xff] %v554_v61  ;;  %v557_v63 = vsel %vm525_vm2, %v509_v55, %v541_v60 }
 0x1f6   :  { %573 = vst [vmem:[%s905_s4 + $0x18] sm:$0xff] %v557_v63  ;;  %v555_v0 = vsel %vm523_vm3, %v507_v58, %v539_v62  ;;  %v701_v1 = vpop.f32.mrb[4].mxu1 }
 0x1f7   :  { %571 = vst [vmem:[%s905_s4 + $0x8] sm:$0xff] %v555_v0  ;;  %v512_v2 = vadd.f32 %v701_v1, %v835_v48  ;;  %v401_v3 = vpop.f32.mrb[5].mxu1 }
 0x1f8   :  { %v510_v4 = vadd.f32 %v835_v48, %v401_v3  ;;  %v702_v5 = vpop.f32.mrb[6].mxu1 }
 0x1f9   :  { %vm528_vm4 = vcmp.ge.f32.partialorder %v512_v2, 0.0  ;;  %v544_v6 = vmul.f32 0.25, %v512_v2  ;;  %v513_v7 = vadd.f32 %v702_v5, %v835_v48  ;;  %v404_v8 = vpop.f32.mrb[7].mxu1 }
 0x1fa   :  { %vm526_vm5 = vcmp.ge.f32.partialorder %v510_v4, 0.0  ;;  %v542_v9 = vmul.f32 0.25, %v510_v4  ;;  %v511_v10 = vadd.f32 %v835_v48, %v404_v8 }
 0x1fb   :  { %v560_v11 = vsel %vm528_vm4, %v512_v2, %v544_v6  ;;  %vm529_vm6 = vcmp.ge.f32.partialorder %v513_v7, 0.0  ;;  %v545_v12 = vmul.f32 0.25, %v513_v7 }
 0x1fc   :  { %576 = vst [vmem:[%s905_s4 + $0x30] sm:$0xff] %v560_v11  ;;  %v558_v13 = vsel %vm526_vm5, %v510_v4, %v542_v9  ;;  %vm527_vm7 = vcmp.ge.f32.partialorder %v511_v10, 0.0  ;;  %v543_v14 = vmul.f32 0.25, %v511_v10 }
 0x1fd   :  { %574 = vst [vmem:[%s905_s4 + $0x20] sm:$0xff] %v558_v13  ;;  %v561_v15 = vsel %vm529_vm6, %v513_v7, %v545_v12 }
 0x1fe   :  { %577 = vst [vmem:[%s905_s4 + $0x38] sm:$0xff] %v561_v15  ;;  %v559_v16 = vsel %vm527_vm7, %v511_v10, %v543_v14  ;;  %v705_v17 = vpop.f32.mrb[8].mxu1 }
 0x1ff   :  { %575 = vst [vmem:[%s905_s4 + $0x28] sm:$0xff] %v559_v16  ;;  %v516_v18 = vadd.f32 %v705_v17, %v835_v48  ;;  %v417_v19 = vpop.f32.mrb[9].mxu1 }
 0x200   :  { %v514_v20 = vadd.f32 %v835_v48, %v417_v19  ;;  %v706_v21 = vpop.f32.mrb[10].mxu1 }
 0x201   :  { %vm532_vm8 = vcmp.ge.f32.partialorder %v516_v18, 0.0  ;;  %v548_v22 = vmul.f32 0.25, %v516_v18  ;;  %v517_v23 = vadd.f32 %v706_v21, %v835_v48  ;;  %v420_v24 = vpop.f32.mrb[11].mxu1 }
 0x202   :  { %vm530_vm9 = vcmp.ge.f32.partialorder %v514_v20, 0.0  ;;  %v546_v25 = vmul.f32 0.25, %v514_v20  ;;  %v515_v26 = vadd.f32 %v835_v48, %v420_v24 }
 0x203   :  { %v564_v27 = vsel %vm532_vm8, %v516_v18, %v548_v22  ;;  %vm533_vm10 = vcmp.ge.f32.partialorder %v517_v23, 0.0  ;;  %v549_v28 = vmul.f32 0.25, %v517_v23 }
 0x204   :  { %580 = vst [vmem:[%s905_s4 + $0x50] sm:$0xff] %v564_v27  ;;  %v562_v29 = vsel %vm530_vm9, %v514_v20, %v546_v25  ;;  %vm531_vm11 = vcmp.ge.f32.partialorder %v515_v26, 0.0  ;;  %v547_v30 = vmul.f32 0.25, %v515_v26 }
 0x205   :  { %578 = vst [vmem:[%s905_s4 + $0x40] sm:$0xff] %v562_v29  ;;  %v565_v31 = vsel %vm533_vm10, %v517_v23, %v549_v28 }
 0x206   :  { %581 = vst [vmem:[%s905_s4 + $0x58] sm:$0xff] %v565_v31  ;;  %v563_v32 = vsel %vm531_vm11, %v515_v26, %v547_v30  ;;  %v709_v33 = vpop.f32.mrb[12].mxu1 }
 0x207   :  { %579 = vst [vmem:[%s905_s4 + $0x48] sm:$0xff] %v563_v32  ;;  %v520_v34 = vadd.f32 %v709_v33, %v835_v48  ;;  %v433_v35 = vpop.f32.mrb[13].mxu1 }
 0x208   :  { %v518_v36 = vadd.f32 %v835_v48, %v433_v35  ;;  %v710_v37 = vpop.f32.mrb[14].mxu1 }
 0x209   :  { %vm536_vm12 = vcmp.ge.f32.partialorder %v520_v34, 0.0  ;;  %v552_v38 = vmul.f32 0.25, %v520_v34  ;;  %v521_v39 = vadd.f32 %v710_v37, %v835_v48  ;;  %v436_v40 = vpop.f32.mrb[15].mxu1 }
 0x20a   :  { %vm534_vm13 = vcmp.ge.f32.partialorder %v518_v36, 0.0  ;;  %v550_v41 = vmul.f32 0.25, %v518_v36  ;;  %v519_v42 = vadd.f32 %v835_v48, %v436_v40 }
 0x20b   :  { %v568_v43 = vsel %vm536_vm12, %v520_v34, %v552_v38  ;;  %vm537_vm14 = vcmp.ge.f32.partialorder %v521_v39, 0.0  ;;  %v553_v44 = vmul.f32 0.25, %v521_v39 }
 0x20c   :  { %584 = vst [vmem:[%s905_s4 + $0x70] sm:$0xff] %v568_v43  ;;  %v566_v45 = vsel %vm534_vm13, %v518_v36, %v550_v41  ;;  %vm535_vm15 = vcmp.ge.f32.partialorder %v519_v42, 0.0  ;;  %v551_v46 = vmul.f32 0.25, %v519_v42 }
 0x20d   :  { %582 = vst [vmem:[%s905_s4 + $0x60] sm:$0xff] %v566_v45  ;;  %v569_v47 = vsel %vm537_vm14, %v521_v39, %v553_v44 }
 0x20e   :  { %585 = vst [vmem:[%s905_s4 + $0x78] sm:$0xff] %v569_v47  ;;  %v567_v48 = vsel %vm535_vm15, %v519_v42, %v551_v46 }
 0x20f   :  { %583 = vst [vmem:[%s905_s4 + $0x68] sm:$0xff] %v567_v48 }

// kernel: gcn_e_forward.3
= control target key start
LH: loop header
LB: loop body
LE: loop exit
PB: predicated region body
PF: predicated region fallthrough
CT: control target
= control target key end

     0   :  { %s1020_s2 = inlined_call_operand.vmem [shape: bf16[128,128], index: 2, kind: input, shape index: {}]   ;;  %s1021_s1 = inlined_call_operand.vmem [shape: bf16[128,128], index: 1, kind: input, shape index: {}]   ;;  %s1022_s0 = inlined_call_operand.vmem [shape: bf16[128,128], index: 0, kind: input, shape index: {}]   ;;  %s1023_s3 = inlined_call_operand.vmem [shape: f32[1,128], index: 3, kind: input, shape index: {}]   ;;  %s1024_s4 = inlined_call_operand.vmem [shape: bf16[128,128], index: 4, kind: output, shape index: {}]  }
   0x1   :  { %v854_v0 = vld [vmem:[%s1020_s2] sm:$0xff]   ;;  %v855_v1 = vld [vmem:[%s1020_s2 + $0x8] sm:$0xff]   ;;  %v856_v2 = vld [vmem:[%s1020_s2 + $0x10] sm:$0xff]  }
   0x2   :  { %790 = vmatprep.subr.bf16.mxu0 %v854_v0  ;;  %v857_v3 = vld [vmem:[%s1020_s2 + $0x18] sm:$0xff]   ;;  %v862_v4 = vld [vmem:[%s1021_s1] sm:$0xff]   ;;  %v859_v6 = vld [vmem:[%s1020_s2 + $0x28] sm:$0xff]  }
   0x3   :  { %791 = vmatpush3.bf16.msra.mxu0 %v854_v0  ;;  %806 = vmatprep.mubr.bf16.mxu0 %v862_v4  ;;  %v858_v5 = vld [vmem:[%s1020_s2 + $0x20] sm:$0xff]   ;;  %v860_v7 = vld [vmem:[%s1020_s2 + $0x30] sm:$0xff]   ;;  %v861_v8 = vld [vmem:[%s1020_s2 + $0x38] sm:$0xff]  }
   0x4   :  { %792 = vmatprep.subr.bf16.mxu0 %v855_v1  ;;  %v863_v9 = vld [vmem:[%s1021_s1 + $0x8] sm:$0xff]   ;;  %v864_v10 = vld [vmem:[%s1021_s1 + $0x10] sm:$0xff]   ;;  %v865_v11 = vld [vmem:[%s1021_s1 + $0x18] sm:$0xff]  }
   0x5   :  { %v866_v12 = vld [vmem:[%s1021_s1 + $0x20] sm:$0xff]   ;;  %v867_v13 = vld [vmem:[%s1021_s1 + $0x28] sm:$0xff]   ;;  %v868_v14 = vld [vmem:[%s1021_s1 + $0x30] sm:$0xff]  }
   0x6   :  { %v869_v15 = vld [vmem:[%s1021_s1 + $0x38] sm:$0xff]   ;;  %v870_v16 = vld [vmem:[%s1022_s0] sm:$0xff]   ;;  %v871_v41 = vld [vmem:[%s1022_s0 + $0x8] sm:$0xff]  }
   0x7   :  { %793 = vmatpush3.bf16.msra.mxu0 %v855_v1  ;;  %838 = vmatprep.mubr.bf16.mxu1 %v870_v16  ;;  %v872_v42 = vld [vmem:[%s1022_s0 + $0x10] sm:$0xff]   ;;  %v873_v43 = vld [vmem:[%s1022_s0 + $0x18] sm:$0xff]   ;;  %v874_v44 = vld [vmem:[%s1022_s0 + $0x20] sm:$0xff]  }
   0x8   :  { %794 = vmatprep.subr.bf16.mxu0 %v856_v2  ;;  %v875_v45 = vld [vmem:[%s1022_s0 + $0x28] sm:$0xff]   ;;  %v876_v46 = vld [vmem:[%s1022_s0 + $0x30] sm:$0xff]   ;;  %v877_v47 = vld [vmem:[%s1022_s0 + $0x38] sm:$0xff]  }
   0x9   :  { %v978_v48 = vld [vmem:[%s1023_s3] ss:$0 sm:$0xff] }
   0xb   :  { %795 = vmatpush3.bf16.msra.mxu0 %v856_v2 }
   0xc   :  { %796 = vmatprep.subr.bf16.mxu0 %v857_v3 }
   0xf   :  { %797 = vmatpush3.bf16.msra.mxu0 %v857_v3 }
  0x10   :  { %798 = vmatprep.subr.bf16.mxu0 %v858_v5 }
  0x13   :  { %799 = vmatpush3.bf16.msra.mxu0 %v858_v5 }
  0x14   :  { %800 = vmatprep.subr.bf16.mxu0 %v859_v6 }
  0x17   :  { %801 = vmatpush3.bf16.msra.mxu0 %v859_v6 }
  0x18   :  { %802 = vmatprep.subr.bf16.mxu0 %v860_v7 }
  0x1b   :  { %803 = vmatpush3.bf16.msra.mxu0 %v860_v7 }
  0x1c   :  { %804 = vmatprep.subr.bf16.mxu0 %v861_v8 }
  0x1f   :  { %805 = vmatpush3.bf16.msra.mxu0 %v861_v8 }
  0x22   :  { %807 = vmatmul.mubr.bf16.vlgmr.msra.gmra.mrb[0].mxu0 %v863_v9 }
  0x23   :  { %810 = vmatprep.mubr.bf16.mxu0 %v864_v10 }
  0x2a   :  { %811 = vmatmul.mubr.bf16.gmra.mrb[4].mxu0 %v865_v11 }
  0x2b   :  { %814 = vmatprep.mubr.bf16.mxu0 %v866_v12 }
  0x32   :  { %815 = vmatmul.mubr.bf16.gmra.mrb[8].mxu0 %v867_v13 }
  0x33   :  { %818 = vmatprep.mubr.bf16.mxu0 %v868_v14 }
  0x3a   :  { %819 = vmatmul.mubr.bf16.gmra.mrb[12].mxu0 %v869_v15 }
  0xf5   :  { %v808_v17 = vpop.f32.mrb[0].mxu0 }
  0xf6   :  { %v200_v18 = vpop.f32.mrb[1].mxu0 }
  0xf7   :  { %v809_v19 = vpop.f32.mrb[2].mxu0 }
  0xf8   :  { %v296_v20 = vpack.c.bf16 %v809_v19, %v808_v17  ;;  %v203_v21 = vpop.f32.mrb[3].mxu0 }
  0xf9   :  { %v295_v22 = vpack.c.bf16 %v203_v21, %v200_v18 }
  0xfb   :  { %822 = vmatprep.subr.bf16.mxu1 %v295_v22 }
  0xfc   :  { %823 = vmatpush3.bf16.msra.mxu1 %v295_v22 }
  0xfd   :  { %v812_v23 = vpop.f32.mrb[4].mxu0  ;;  %824 = vmatprep.subr.bf16.mxu1 %v296_v20 }
  0xfe   :  { %v216_v24 = vpop.f32.mrb[5].mxu0 }
  0xff   :  { %v813_v25 = vpop.f32.mrb[6].mxu0 }
 0x100   :  { %v298_v26 = vpack.c.bf16 %v813_v25, %v812_v23  ;;  %v219_v27 = vpop.f32.mrb[7].mxu0  ;;  %825 = vmatpush3.bf16.msra.mxu1 %v296_v20 }
 0x101   :  { %v297_v28 = vpack.c.bf16 %v219_v27, %v216_v24 }
 0x103   :  { %826 = vmatprep.subr.bf16.mxu1 %v297_v28 }
 0x104   :  { %827 = vmatpush3.bf16.msra.mxu1 %v297_v28 }
 0x105   :  { %v816_v29 = vpop.f32.mrb[8].mxu0  ;;  %828 = vmatprep.subr.bf16.mxu1 %v298_v26 }
 0x106   :  { %v232_v30 = vpop.f32.mrb[9].mxu0 }
 0x107   :  { %v817_v31 = vpop.f32.mrb[10].mxu0 }
 0x108   :  { %v300_v32 = vpack.c.bf16 %v817_v31, %v816_v29  ;;  %v235_v33 = vpop.f32.mrb[11].mxu0  ;;  %829 = vmatpush3.bf16.msra.mxu1 %v298_v26 }
 0x109   :  { %v299_v34 = vpack.c.bf16 %v235_v33, %v232_v30 }
 0x10b   :  { %830 = vmatprep.subr.bf16.mxu1 %v299_v34 }
 0x10c   :  { %831 = vmatpush3.bf16.msra.mxu1 %v299_v34 }
 0x10d   :  { %v820_v35 = vpop.f32.mrb[12].mxu0  ;;  %832 = vmatprep.subr.bf16.mxu1 %v300_v32 }
 0x10e   :  { %v248_v36 = vpop.f32.mrb[13].mxu0 }
 0x10f   :  { %v821_v37 = vpop.f32.mrb[14].mxu0 }
 0x110   :  { %v302_v38 = vpack.c.bf16 %v821_v37, %v820_v35  ;;  %v251_v39 = vpop.f32.mrb[15].mxu0  ;;  %833 = vmatpush3.bf16.msra.mxu1 %v300_v32 }
 0x111   :  { %v301_v40 = vpack.c.bf16 %v251_v39, %v248_v36 }
 0x113   :  { %834 = vmatprep.subr.bf16.mxu1 %v301_v40 }
 0x114   :  { %835 = vmatpush3.bf16.msra.mxu1 %v301_v40 }
 0x115   :  { %836 = vmatprep.subr.bf16.mxu1 %v302_v38 }
 0x118   :  { %837 = vmatpush3.bf16.msra.mxu1 %v302_v38 }
 0x11b   :  { %839 = vmatmul.mubr.bf16.vlgmr.msra.gmra.mrb[0].mxu1 %v871_v41 }
 0x11c   :  { %842 = vmatprep.mubr.bf16.mxu1 %v872_v42 }
 0x123   :  { %843 = vmatmul.mubr.bf16.gmra.mrb[4].mxu1 %v873_v43 }
 0x124   :  { %846 = vmatprep.mubr.bf16.mxu1 %v874_v44 }
 0x12b   :  { %847 = vmatmul.mubr.bf16.gmra.mrb[8].mxu1 %v875_v45 }
 0x12c   :  { %850 = vmatprep.mubr.bf16.mxu1 %v876_v46 }
 0x133   :  { %851 = vmatmul.mubr.bf16.gmra.mrb[12].mxu1 %v877_v47 }
 0x1ee   :  { %v840_v49 = vpop.f32.mrb[0].mxu1 }
 0x1ef   :  { %v508_v50 = vadd.f32 %v840_v49, %v978_v48  ;;  %v385_v51 = vpop.f32.mrb[1].mxu1 }
 0x1f0   :  { %v506_v52 = vadd.f32 %v978_v48, %v385_v51  ;;  %v841_v53 = vpop.f32.mrb[2].mxu1 }
 0x1f1   :  { %v540_v54 = vmul.f32 0.25, %v508_v50  ;;  %v509_v55 = vadd.f32 %v841_v53, %v978_v48  ;;  %v388_v56 = vpop.f32.mrb[3].mxu1  ;;  %vm524_vm0 = vcmp.ge.f32.partialorder %v508_v50, 0.0 }
 0x1f2   :  { %v538_v57 = vmul.f32 0.25, %v506_v52  ;;  %v507_v58 = vadd.f32 %v978_v48, %v388_v56  ;;  %vm522_vm1 = vcmp.ge.f32.partialorder %v506_v52, 0.0 }
 0x1f3   :  { %vm525_vm2 = vcmp.ge.f32.partialorder %v509_v55, 0.0  ;;  %v541_v59 = vmul.f32 0.25, %v509_v55  ;;  %v556_v61 = vsel %vm524_vm0, %v508_v50, %v540_v54 }
 0x1f4   :  { %vm523_vm3 = vcmp.ge.f32.partialorder %v507_v58, 0.0  ;;  %v539_v60 = vmul.f32 0.25, %v507_v58  ;;  %v554_v63 = vsel %vm522_vm1, %v506_v52, %v538_v57 }
 0x1f5   :  { %v557_v62 = vsel %vm525_vm2, %v509_v55, %v541_v59 }
 0x1f6   :  { %v719_v0 = vpack.c.bf16 %v557_v62, %v556_v61  ;;  %v555_v1 = vsel %vm523_vm3, %v507_v58, %v539_v60  ;;  %v844_v2 = vpop.f32.mrb[4].mxu1 }
 0x1f7   :  { %v714_v3 = vpack.c.bf16 %v555_v1, %v554_v63  ;;  %v512_v4 = vadd.f32 %v844_v2, %v978_v48  ;;  %v401_v5 = vpop.f32.mrb[5].mxu1 }
 0x1f8   :  { %751 = vst [vmem:[%s1024_s4 + $0x8] sm:$0xff] %v719_v0   ;;  %v510_v6 = vadd.f32 %v978_v48, %v401_v5  ;;  %v845_v7 = vpop.f32.mrb[6].mxu1 }
 0x1f9   :  { %715 = vst [vmem:[%s1024_s4] sm:$0xff] %v714_v3   ;;  %v544_v8 = vmul.f32 0.25, %v512_v4  ;;  %v513_v9 = vadd.f32 %v845_v7, %v978_v48  ;;  %v404_v10 = vpop.f32.mrb[7].mxu1  ;;  %vm528_vm4 = vcmp.ge.f32.partialorder %v512_v4, 0.0 }
 0x1fa   :  { %v542_v11 = vmul.f32 0.25, %v510_v6  ;;  %v511_v12 = vadd.f32 %v978_v48, %v404_v10  ;;  %vm526_vm5 = vcmp.ge.f32.partialorder %v510_v6, 0.0 }
 0x1fb   :  { %vm529_vm6 = vcmp.ge.f32.partialorder %v513_v9, 0.0  ;;  %v545_v13 = vmul.f32 0.25, %v513_v9  ;;  %v560_v15 = vsel %vm528_vm4, %v512_v4, %v544_v8 }
 0x1fc   :  { %vm527_vm7 = vcmp.ge.f32.partialorder %v511_v12, 0.0  ;;  %v543_v14 = vmul.f32 0.25, %v511_v12  ;;  %v558_v17 = vsel %vm526_vm5, %v510_v6, %v542_v11 }
 0x1fd   :  { %v561_v16 = vsel %vm529_vm6, %v513_v9, %v545_v13 }
 0x1fe   :  { %v729_v18 = vpack.c.bf16 %v561_v16, %v560_v15  ;;  %v559_v19 = vsel %vm527_vm7, %v511_v12, %v543_v14  ;;  %v848_v20 = vpop.f32.mrb[8].mxu1 }
 0x1ff   :  { %v724_v21 = vpack.c.bf16 %v559_v19, %v558_v17  ;;  %v516_v22 = vadd.f32 %v848_v20, %v978_v48  ;;  %v417_v23 = vpop.f32.mrb[9].mxu1 }
 0x200   :  { %753 = vst [vmem:[%s1024_s4 + $0x18] sm:$0xff] %v729_v18   ;;  %v514_v24 = vadd.f32 %v978_v48, %v417_v23  ;;  %v849_v25 = vpop.f32.mrb[10].mxu1 }
 0x201   :  { %752 = vst [vmem:[%s1024_s4 + $0x10] sm:$0xff] %v724_v21   ;;  %v548_v26 = vmul.f32 0.25, %v516_v22  ;;  %v517_v27 = vadd.f32 %v849_v25, %v978_v48  ;;  %v420_v28 = vpop.f32.mrb[11].mxu1  ;;  %vm532_vm8 = vcmp.ge.f32.partialorder %v516_v22, 0.0 }
 0x202   :  { %v546_v29 = vmul.f32 0.25, %v514_v24  ;;  %v515_v30 = vadd.f32 %v978_v48, %v420_v28  ;;  %vm530_vm9 = vcmp.ge.f32.partialorder %v514_v24, 0.0 }
 0x203   :  { %vm533_vm10 = vcmp.ge.f32.partialorder %v517_v27, 0.0  ;;  %v549_v31 = vmul.f32 0.25, %v517_v27  ;;  %v564_v33 = vsel %vm532_vm8, %v516_v22, %v548_v26 }
 0x204   :  { %vm531_vm11 = vcmp.ge.f32.partialorder %v515_v30, 0.0  ;;  %v547_v32 = vmul.f32 0.25, %v515_v30  ;;  %v562_v35 = vsel %vm530_vm9, %v514_v24, %v546_v29 }
 0x205   :  { %v565_v34 = vsel %vm533_vm10, %v517_v27, %v549_v31 }
 0x206   :  { %v739_v36 = vpack.c.bf16 %v565_v34, %v564_v33  ;;  %v563_v37 = vsel %vm531_vm11, %v515_v30, %v547_v32  ;;  %v852_v38 = vpop.f32.mrb[12].mxu1 }
 0x207   :  { %v734_v39 = vpack.c.bf16 %v563_v37, %v562_v35  ;;  %v520_v40 = vadd.f32 %v852_v38, %v978_v48  ;;  %v433_v41 = vpop.f32.mrb[13].mxu1 }
 0x208   :  { %755 = vst [vmem:[%s1024_s4 + $0x28] sm:$0xff] %v739_v36   ;;  %v518_v42 = vadd.f32 %v978_v48, %v433_v41  ;;  %v853_v43 = vpop.f32.mrb[14].mxu1 }
 0x209   :  { %754 = vst [vmem:[%s1024_s4 + $0x20] sm:$0xff] %v734_v39   ;;  %v552_v44 = vmul.f32 0.25, %v520_v40  ;;  %v521_v45 = vadd.f32 %v853_v43, %v978_v48  ;;  %v436_v46 = vpop.f32.mrb[15].mxu1  ;;  %vm536_vm12 = vcmp.ge.f32.partialorder %v520_v40, 0.0 }
 0x20a   :  { %v550_v47 = vmul.f32 0.25, %v518_v42  ;;  %v519_v49 = vadd.f32 %v978_v48, %v436_v46  ;;  %vm534_vm13 = vcmp.ge.f32.partialorder %v518_v42, 0.0 }
 0x20b   :  { %vm537_vm14 = vcmp.ge.f32.partialorder %v521_v45, 0.0  ;;  %v553_v50 = vmul.f32 0.25, %v521_v45  ;;  %v568_v52 = vsel %vm536_vm12, %v520_v40, %v552_v44 }
 0x20c   :  { %vm535_vm15 = vcmp.ge.f32.partialorder %v519_v49, 0.0  ;;  %v551_v51 = vmul.f32 0.25, %v519_v49  ;;  %v566_v54 = vsel %vm534_vm13, %v518_v42, %v550_v47 }
 0x20d   :  { %v569_v53 = vsel %vm537_vm14, %v521_v45, %v553_v50 }
 0x20e   :  { %v749_v55 = vpack.c.bf16 %v569_v53, %v568_v52  ;;  %v567_v56 = vsel %vm535_vm15, %v519_v49, %v551_v51 }
 0x20f   :  { %v744_v57 = vpack.c.bf16 %v567_v56, %v566_v54 }
 0x210   :  { %757 = vst [vmem:[%s1024_s4 + $0x38] sm:$0xff] %v749_v55  }
 0x211   :  { %756 = vst [vmem:[%s1024_s4 + $0x30] sm:$0xff] %v744_v57  }

</bundles_post_ra>
